<compile_context>
chip_gen: v7x
topology: tpu7x:2x2x1
jax: 0.10.0
libtpu: 0.0.40
codegen_flags: <defaults>
</compile_context>

<pallas_src>
import functools

import jax
import jax.numpy as jnp
from jax.experimental import pallas as pl
from jax.experimental.pallas import tpu as pltpu

H1, H2, OUT = 4, 5, 1        # layer widths from the PyTorch module
LANES = 128
SUBLANES = 8
VREG_BATCH = LANES * SUBLANES   # 1024 f32 batch elements per full vreg


def _make_value_net_kernel(input_dim):
    """Build the kernel + flat-parameter layout for a given input_dim."""
    # Offsets into the flat parameter slab (PyTorch [out, in] row-major).
    o_w1 = 0
    o_b1 = o_w1 + H1 * input_dim
    o_w2 = o_b1 + H1
    o_b2 = o_w2 + H2 * H1
    o_w3 = o_b2 + H2
    o_b3 = o_w3 + OUT * H2
    n_params = o_b3 + OUT

    def kernel(p_ref, x_ref, out_ref):
        # p_ref:   [n_params]        f32 in SMEM (scalar reads)
        # x_ref:   [D,   tb//128, 128] f32 (batch on lanes, 8-sublane dense)
        # out_ref: [OUT, tb//128, 128] f32
        xs = [x_ref[k] for k in range(input_dim)]        # each [tb//128, 128]

        # fc1 + ReLU : h1[j] = relu(b1[j] + sum_k w1[j,k] * x[k])
        h1 = []
        for j in range(H1):
            acc = xs[0] * p_ref[o_w1 + j * input_dim]
            for k in range(1, input_dim):
                acc = acc + xs[k] * p_ref[o_w1 + j * input_dim + k]
            h1.append(jnp.maximum(acc + p_ref[o_b1 + j], 0.0))

        # fc2 + ReLU
        h2 = []
        for j in range(H2):
            acc = h1[0] * p_ref[o_w2 + j * H1]
            for k in range(1, H1):
                acc = acc + h1[k] * p_ref[o_w2 + j * H1 + k]
            h2.append(jnp.maximum(acc + p_ref[o_b2 + j], 0.0))

        # fc3 (no activation) -> fully lane- and sublane-dense store
        for j in range(OUT):
            acc = h2[0] * p_ref[o_w3 + j * H2]
            for k in range(1, H2):
                acc = acc + h2[k] * p_ref[o_w3 + j * H2 + k]
            out_ref[j] = (acc + p_ref[o_b3 + j]).astype(out_ref.dtype)

    return kernel, n_params


def pack_params(params):
    """Flatten PyTorch-layout params (w:[out,in], b:[out]) into one f32 slab."""
    parts = [params["w1"].reshape(-1), params["b1"].reshape(-1),
             params["w2"].reshape(-1), params["b2"].reshape(-1),
             params["w3"].reshape(-1), params["b3"].reshape(-1)]
    return jnp.concatenate(parts).astype(jnp.float32)


def _choose_tile(batch, block_b):
    """Pick the batch tile (static, trace-time Python).

    - tb is a multiple of 1024 so every activation row is a full (8,128) tile.
    - tb <= block_b (already VMEM-capped by the caller).
    - >= 2 grid tiles whenever there are >= 2 vreg-chunks of batch, so the
      'parallel' batch axis shards across both TensorCores on v7x.
    """
    n_chunks = pl.cdiv(batch, VREG_BATCH)
    max_chunks = max(1, block_b // VREG_BATCH)
    if n_chunks >= 2:
        chunks_per_tile = min(max_chunks, pl.cdiv(n_chunks, 2))
    else:
        chunks_per_tile = 1
    tb = chunks_per_tile * VREG_BATCH
    n_tiles = pl.cdiv(n_chunks, chunks_per_tile)
    b_pad = n_tiles * tb
    return tb, n_tiles, b_pad


@functools.partial(jax.jit, static_argnames=("block_b",))
def value_net_forward(x, params, *, block_b=131072):
    """x: [B, input_dim] float32 -> [B, 1] float32."""
    B, D = x.shape
    kernel, _ = _make_value_net_kernel(D)

    # Cap the tile so the double-buffered VMEM footprint (x + out tiles)
    # stays ~12 MiB, under v5e's 16 MiB scoped-VMEM default.
    vmem_budget = 12 * 1024 * 1024
    max_tb = max(VREG_BATCH,
                 (vmem_budget // (2 * (D + OUT) * 4)) // VREG_BATCH * VREG_BATCH)
    tb, n_tiles, b_pad = _choose_tile(B, min(block_b, max_tb))
    r = tb // LANES                       # sublane-rows per tile (multiple of 8)

    # Batch-on-lanes layout: transpose + pad only the trailing remainder
    # (fuses into a single pass), then a free contiguous reshape to 3-D.
    # TODO(synk): if upstream keeps activations stored as [D, B] (batch on
    # lanes), this transpose and the final .T disappear entirely.
    xt = x.astype(jnp.float32).T                          # [D, B]
    if b_pad != B:
        xt = jnp.pad(xt, ((0, 0), (0, b_pad - B)))        # [D, b_pad]
    x3 = xt.reshape(D, b_pad // LANES, LANES)             # [D, R, 128]

    p_flat = pack_params(params)

    out3 = pl.pallas_call(
        kernel,
        out_shape=jax.ShapeDtypeStruct((OUT, b_pad // LANES, LANES),
                                       jnp.float32),
        grid=(n_tiles,),
        in_specs=[
            pl.BlockSpec(memory_space=pltpu.MemorySpace.SMEM),   # param slab
            pl.BlockSpec((D, r, LANES), lambda i: (0, i, 0)),    # x tile
        ],
        out_specs=pl.BlockSpec((OUT, r, LANES), lambda i: (0, i, 0)),
        compiler_params=pltpu.CompilerParams(
            dimension_semantics=("parallel",)),
    )(p_flat, x3)

    return out3.reshape(OUT, b_pad)[:, :B].T                     # [B, 1]


def init_params(key, input_dim):
    """torch.nn.Linear-style init, PyTorch layout: w [out, in], b [out]."""
    def linear(key, fan_in, fan_out):
        kw, kb = jax.random.split(key)
        bound = 1.0 / jnp.sqrt(jnp.float32(fan_in))
        w = jax.random.uniform(kw, (fan_out, fan_in), jnp.float32,
                               minval=-bound, maxval=bound)
        b = jax.random.uniform(kb, (fan_out,), jnp.float32,
                               minval=-bound, maxval=bound)
        return w, b

    k1, k2, k3 = jax.random.split(key, 3)
    w1, b1 = linear(k1, input_dim, H1)
    w2, b2 = linear(k2, H1, H2)
    w3, b3 = linear(k3, H2, OUT)
    return {"w1": w1, "b1": b1, "w2": w2, "b2": b2, "w3": w3, "b3": b3}


def value_net_ref(x, p):
    """Pure-JAX reference (PyTorch Linear semantics)."""
    h1 = jnp.maximum(x @ p["w1"].T + p["b1"], 0.0)
    h2 = jnp.maximum(h1 @ p["w2"].T + p["b2"], 0.0)
    return h2 @ p["w3"].T + p["b3"]


if __name__ == "__main__":
    key = jax.random.PRNGKey(0)
    k_param, k_x1, k_x2 = jax.random.split(key, 3)

    input_dim = 4      # CartPole observation dim
    params = init_params(k_param, input_dim)

    # Case 1: small batch (single tile, padded lanes sliced off).
    x1 = jax.random.normal(k_x1, (300, input_dim), jnp.float32)
    out1 = jax.block_until_ready(value_net_forward(x1, params))
    ref1 = value_net_ref(x1, params)
    assert out1.shape == (300, 1), out1.shape
    assert jnp.allclose(out1, ref1, atol=1e-5, rtol=1e-5)

    # Case 2: multi-tile grid path (2 tiles of 2048 batch lanes) + padding.
    x2 = jax.random.normal(k_x2, (2500, input_dim), jnp.float32)
    out2 = jax.block_until_ready(value_net_forward(x2, params))
    ref2 = value_net_ref(x2, params)
    assert out2.shape == (2500, 1), out2.shape
    assert jnp.allclose(out2, ref2, atol=1e-5, rtol=1e-5)

    print("KERNEL_OK")
</pallas_src>

<mosaic_0001>
module attributes {stable_mosaic.version = 11 : i64} {
  func.func @kernel(%arg0: i32, %arg1: memref<51xf32, #tpu.memory_space<smem>>, %arg2: memref<4x8x128xf32, #tpu.memory_space<vmem>>, %arg3: memref<1x8x128xf32, #tpu.memory_space<vmem>>) attributes {dimension_semantics = [#tpu.dimension_semantics<parallel>], iteration_bounds = array<i64: 1>, scalar_prefetch = 0 : i64, scratch_operands = 0 : i64, tpu.core_type = #tpu.core_type<tc>, window_params = [{transform_indices = @transform_0, window_bounds = array<i64: 51>}, {transform_indices = @transform_1, window_bounds = array<i64: 4, 8, 128>}, {transform_indices = @transform_2, window_bounds = array<i64: 1, 8, 128>}]} {
    %c0 = arith.constant 0 : index
    %c0_0 = arith.constant 0 : index
    %c0_1 = arith.constant 0 : index
    %0 = vector.load %arg2[%c0, %c0_0, %c0_1] : memref<4x8x128xf32, #tpu.memory_space<vmem>>, vector<1x8x128xf32>
    %1 = vector.shape_cast %0 : vector<1x8x128xf32> to vector<8x128xf32>
    %c1 = arith.constant 1 : index
    %c0_2 = arith.constant 0 : index
    %c0_3 = arith.constant 0 : index
    %2 = vector.load %arg2[%c1, %c0_2, %c0_3] : memref<4x8x128xf32, #tpu.memory_space<vmem>>, vector<1x8x128xf32>
    %3 = vector.shape_cast %2 : vector<1x8x128xf32> to vector<8x128xf32>
    %c2 = arith.constant 2 : index
    %c0_4 = arith.constant 0 : index
    %c0_5 = arith.constant 0 : index
    %4 = vector.load %arg2[%c2, %c0_4, %c0_5] : memref<4x8x128xf32, #tpu.memory_space<vmem>>, vector<1x8x128xf32>
    %5 = vector.shape_cast %4 : vector<1x8x128xf32> to vector<8x128xf32>
    %c3 = arith.constant 3 : index
    %c0_6 = arith.constant 0 : index
    %c0_7 = arith.constant 0 : index
    %6 = vector.load %arg2[%c3, %c0_6, %c0_7] : memref<4x8x128xf32, #tpu.memory_space<vmem>>, vector<1x8x128xf32>
    %7 = vector.shape_cast %6 : vector<1x8x128xf32> to vector<8x128xf32>
    %c0_8 = arith.constant 0 : index
    %8 = memref.load %arg1[%c0_8] : memref<51xf32, #tpu.memory_space<smem>>
    %9 = vector.broadcast %8 : f32 to vector<8x128xf32>
    %10 = arith.mulf %1, %9 : vector<8x128xf32>
    %c1_9 = arith.constant 1 : index
    %11 = memref.load %arg1[%c1_9] : memref<51xf32, #tpu.memory_space<smem>>
    %12 = vector.broadcast %11 : f32 to vector<8x128xf32>
    %13 = arith.mulf %3, %12 : vector<8x128xf32>
    %14 = arith.addf %10, %13 : vector<8x128xf32>
    %c2_10 = arith.constant 2 : index
    %15 = memref.load %arg1[%c2_10] : memref<51xf32, #tpu.memory_space<smem>>
    %16 = vector.broadcast %15 : f32 to vector<8x128xf32>
    %17 = arith.mulf %5, %16 : vector<8x128xf32>
    %18 = arith.addf %14, %17 : vector<8x128xf32>
    %c3_11 = arith.constant 3 : index
    %19 = memref.load %arg1[%c3_11] : memref<51xf32, #tpu.memory_space<smem>>
    %20 = vector.broadcast %19 : f32 to vector<8x128xf32>
    %21 = arith.mulf %7, %20 : vector<8x128xf32>
    %22 = arith.addf %18, %21 : vector<8x128xf32>
    %c16 = arith.constant 16 : index
    %23 = memref.load %arg1[%c16] : memref<51xf32, #tpu.memory_space<smem>>
    %24 = vector.broadcast %23 : f32 to vector<8x128xf32>
    %25 = arith.addf %22, %24 : vector<8x128xf32>
    %cst = arith.constant 0.000000e+00 : f32
    %26 = vector.broadcast %cst : f32 to vector<8x128xf32>
    %27 = arith.maximumf %25, %26 : vector<8x128xf32>
    %c4 = arith.constant 4 : index
    %28 = memref.load %arg1[%c4] : memref<51xf32, #tpu.memory_space<smem>>
    %29 = vector.broadcast %28 : f32 to vector<8x128xf32>
    %30 = arith.mulf %1, %29 : vector<8x128xf32>
    %c5 = arith.constant 5 : index
    %31 = memref.load %arg1[%c5] : memref<51xf32, #tpu.memory_space<smem>>
    %32 = vector.broadcast %31 : f32 to vector<8x128xf32>
    %33 = arith.mulf %3, %32 : vector<8x128xf32>
    %34 = arith.addf %30, %33 : vector<8x128xf32>
    %c6 = arith.constant 6 : index
    %35 = memref.load %arg1[%c6] : memref<51xf32, #tpu.memory_space<smem>>
    %36 = vector.broadcast %35 : f32 to vector<8x128xf32>
    %37 = arith.mulf %5, %36 : vector<8x128xf32>
    %38 = arith.addf %34, %37 : vector<8x128xf32>
    %c7 = arith.constant 7 : index
    %39 = memref.load %arg1[%c7] : memref<51xf32, #tpu.memory_space<smem>>
    %40 = vector.broadcast %39 : f32 to vector<8x128xf32>
    %41 = arith.mulf %7, %40 : vector<8x128xf32>
    %42 = arith.addf %38, %41 : vector<8x128xf32>
    %c17 = arith.constant 17 : index
    %43 = memref.load %arg1[%c17] : memref<51xf32, #tpu.memory_space<smem>>
    %44 = vector.broadcast %43 : f32 to vector<8x128xf32>
    %45 = arith.addf %42, %44 : vector<8x128xf32>
    %cst_12 = arith.constant 0.000000e+00 : f32
    %46 = vector.broadcast %cst_12 : f32 to vector<8x128xf32>
    %47 = arith.maximumf %45, %46 : vector<8x128xf32>
    %c8 = arith.constant 8 : index
    %48 = memref.load %arg1[%c8] : memref<51xf32, #tpu.memory_space<smem>>
    %49 = vector.broadcast %48 : f32 to vector<8x128xf32>
    %50 = arith.mulf %1, %49 : vector<8x128xf32>
    %c9 = arith.constant 9 : index
    %51 = memref.load %arg1[%c9] : memref<51xf32, #tpu.memory_space<smem>>
    %52 = vector.broadcast %51 : f32 to vector<8x128xf32>
    %53 = arith.mulf %3, %52 : vector<8x128xf32>
    %54 = arith.addf %50, %53 : vector<8x128xf32>
    %c10 = arith.constant 10 : index
    %55 = memref.load %arg1[%c10] : memref<51xf32, #tpu.memory_space<smem>>
    %56 = vector.broadcast %55 : f32 to vector<8x128xf32>
    %57 = arith.mulf %5, %56 : vector<8x128xf32>
    %58 = arith.addf %54, %57 : vector<8x128xf32>
    %c11 = arith.constant 11 : index
    %59 = memref.load %arg1[%c11] : memref<51xf32, #tpu.memory_space<smem>>
    %60 = vector.broadcast %59 : f32 to vector<8x128xf32>
    %61 = arith.mulf %7, %60 : vector<8x128xf32>
    %62 = arith.addf %58, %61 : vector<8x128xf32>
    %c18 = arith.constant 18 : index
    %63 = memref.load %arg1[%c18] : memref<51xf32, #tpu.memory_space<smem>>
    %64 = vector.broadcast %63 : f32 to vector<8x128xf32>
    %65 = arith.addf %62, %64 : vector<8x128xf32>
    %cst_13 = arith.constant 0.000000e+00 : f32
    %66 = vector.broadcast %cst_13 : f32 to vector<8x128xf32>
    %67 = arith.maximumf %65, %66 : vector<8x128xf32>
    %c12 = arith.constant 12 : index
    %68 = memref.load %arg1[%c12] : memref<51xf32, #tpu.memory_space<smem>>
    %69 = vector.broadcast %68 : f32 to vector<8x128xf32>
    %70 = arith.mulf %1, %69 : vector<8x128xf32>
    %c13 = arith.constant 13 : index
    %71 = memref.load %arg1[%c13] : memref<51xf32, #tpu.memory_space<smem>>
    %72 = vector.broadcast %71 : f32 to vector<8x128xf32>
    %73 = arith.mulf %3, %72 : vector<8x128xf32>
    %74 = arith.addf %70, %73 : vector<8x128xf32>
    %c14 = arith.constant 14 : index
    %75 = memref.load %arg1[%c14] : memref<51xf32, #tpu.memory_space<smem>>
    %76 = vector.broadcast %75 : f32 to vector<8x128xf32>
    %77 = arith.mulf %5, %76 : vector<8x128xf32>
    %78 = arith.addf %74, %77 : vector<8x128xf32>
    %c15 = arith.constant 15 : index
    %79 = memref.load %arg1[%c15] : memref<51xf32, #tpu.memory_space<smem>>
    %80 = vector.broadcast %79 : f32 to vector<8x128xf32>
    %81 = arith.mulf %7, %80 : vector<8x128xf32>
    %82 = arith.addf %78, %81 : vector<8x128xf32>
    %c19 = arith.constant 19 : index
    %83 = memref.load %arg1[%c19] : memref<51xf32, #tpu.memory_space<smem>>
    %84 = vector.broadcast %83 : f32 to vector<8x128xf32>
    %85 = arith.addf %82, %84 : vector<8x128xf32>
    %cst_14 = arith.constant 0.000000e+00 : f32
    %86 = vector.broadcast %cst_14 : f32 to vector<8x128xf32>
    %87 = arith.maximumf %85, %86 : vector<8x128xf32>
    %c20 = arith.constant 20 : index
    %88 = memref.load %arg1[%c20] : memref<51xf32, #tpu.memory_space<smem>>
    %89 = vector.broadcast %88 : f32 to vector<8x128xf32>
    %90 = arith.mulf %27, %89 : vector<8x128xf32>
    %c21 = arith.constant 21 : index
    %91 = memref.load %arg1[%c21] : memref<51xf32, #tpu.memory_space<smem>>
    %92 = vector.broadcast %91 : f32 to vector<8x128xf32>
    %93 = arith.mulf %47, %92 : vector<8x128xf32>
    %94 = arith.addf %90, %93 : vector<8x128xf32>
    %c22 = arith.constant 22 : index
    %95 = memref.load %arg1[%c22] : memref<51xf32, #tpu.memory_space<smem>>
    %96 = vector.broadcast %95 : f32 to vector<8x128xf32>
    %97 = arith.mulf %67, %96 : vector<8x128xf32>
    %98 = arith.addf %94, %97 : vector<8x128xf32>
    %c23 = arith.constant 23 : index
    %99 = memref.load %arg1[%c23] : memref<51xf32, #tpu.memory_space<smem>>
    %100 = vector.broadcast %99 : f32 to vector<8x128xf32>
    %101 = arith.mulf %87, %100 : vector<8x128xf32>
    %102 = arith.addf %98, %101 : vector<8x128xf32>
    %c40 = arith.constant 40 : index
    %103 = memref.load %arg1[%c40] : memref<51xf32, #tpu.memory_space<smem>>
    %104 = vector.broadcast %103 : f32 to vector<8x128xf32>
    %105 = arith.addf %102, %104 : vector<8x128xf32>
    %cst_15 = arith.constant 0.000000e+00 : f32
    %106 = vector.broadcast %cst_15 : f32 to vector<8x128xf32>
    %107 = arith.maximumf %105, %106 : vector<8x128xf32>
    %c24 = arith.constant 24 : index
    %108 = memref.load %arg1[%c24] : memref<51xf32, #tpu.memory_space<smem>>
    %109 = vector.broadcast %108 : f32 to vector<8x128xf32>
    %110 = arith.mulf %27, %109 : vector<8x128xf32>
    %c25 = arith.constant 25 : index
    %111 = memref.load %arg1[%c25] : memref<51xf32, #tpu.memory_space<smem>>
    %112 = vector.broadcast %111 : f32 to vector<8x128xf32>
    %113 = arith.mulf %47, %112 : vector<8x128xf32>
    %114 = arith.addf %110, %113 : vector<8x128xf32>
    %c26 = arith.constant 26 : index
    %115 = memref.load %arg1[%c26] : memref<51xf32, #tpu.memory_space<smem>>
    %116 = vector.broadcast %115 : f32 to vector<8x128xf32>
    %117 = arith.mulf %67, %116 : vector<8x128xf32>
    %118 = arith.addf %114, %117 : vector<8x128xf32>
    %c27 = arith.constant 27 : index
    %119 = memref.load %arg1[%c27] : memref<51xf32, #tpu.memory_space<smem>>
    %120 = vector.broadcast %119 : f32 to vector<8x128xf32>
    %121 = arith.mulf %87, %120 : vector<8x128xf32>
    %122 = arith.addf %118, %121 : vector<8x128xf32>
    %c41 = arith.constant 41 : index
    %123 = memref.load %arg1[%c41] : memref<51xf32, #tpu.memory_space<smem>>
    %124 = vector.broadcast %123 : f32 to vector<8x128xf32>
    %125 = arith.addf %122, %124 : vector<8x128xf32>
    %cst_16 = arith.constant 0.000000e+00 : f32
    %126 = vector.broadcast %cst_16 : f32 to vector<8x128xf32>
    %127 = arith.maximumf %125, %126 : vector<8x128xf32>
    %c28 = arith.constant 28 : index
    %128 = memref.load %arg1[%c28] : memref<51xf32, #tpu.memory_space<smem>>
    %129 = vector.broadcast %128 : f32 to vector<8x128xf32>
    %130 = arith.mulf %27, %129 : vector<8x128xf32>
    %c29 = arith.constant 29 : index
    %131 = memref.load %arg1[%c29] : memref<51xf32, #tpu.memory_space<smem>>
    %132 = vector.broadcast %131 : f32 to vector<8x128xf32>
    %133 = arith.mulf %47, %132 : vector<8x128xf32>
    %134 = arith.addf %130, %133 : vector<8x128xf32>
    %c30 = arith.constant 30 : index
    %135 = memref.load %arg1[%c30] : memref<51xf32, #tpu.memory_space<smem>>
    %136 = vector.broadcast %135 : f32 to vector<8x128xf32>
    %137 = arith.mulf %67, %136 : vector<8x128xf32>
    %138 = arith.addf %134, %137 : vector<8x128xf32>
    %c31 = arith.constant 31 : index
    %139 = memref.load %arg1[%c31] : memref<51xf32, #tpu.memory_space<smem>>
    %140 = vector.broadcast %139 : f32 to vector<8x128xf32>
    %141 = arith.mulf %87, %140 : vector<8x128xf32>
    %142 = arith.addf %138, %141 : vector<8x128xf32>
    %c42 = arith.constant 42 : index
    %143 = memref.load %arg1[%c42] : memref<51xf32, #tpu.memory_space<smem>>
    %144 = vector.broadcast %143 : f32 to vector<8x128xf32>
    %145 = arith.addf %142, %144 : vector<8x128xf32>
    %cst_17 = arith.constant 0.000000e+00 : f32
    %146 = vector.broadcast %cst_17 : f32 to vector<8x128xf32>
    %147 = arith.maximumf %145, %146 : vector<8x128xf32>
    %c32 = arith.constant 32 : index
    %148 = memref.load %arg1[%c32] : memref<51xf32, #tpu.memory_space<smem>>
    %149 = vector.broadcast %148 : f32 to vector<8x128xf32>
    %150 = arith.mulf %27, %149 : vector<8x128xf32>
    %c33 = arith.constant 33 : index
    %151 = memref.load %arg1[%c33] : memref<51xf32, #tpu.memory_space<smem>>
    %152 = vector.broadcast %151 : f32 to vector<8x128xf32>
    %153 = arith.mulf %47, %152 : vector<8x128xf32>
    %154 = arith.addf %150, %153 : vector<8x128xf32>
    %c34 = arith.constant 34 : index
    %155 = memref.load %arg1[%c34] : memref<51xf32, #tpu.memory_space<smem>>
    %156 = vector.broadcast %155 : f32 to vector<8x128xf32>
    %157 = arith.mulf %67, %156 : vector<8x128xf32>
    %158 = arith.addf %154, %157 : vector<8x128xf32>
    %c35 = arith.constant 35 : index
    %159 = memref.load %arg1[%c35] : memref<51xf32, #tpu.memory_space<smem>>
    %160 = vector.broadcast %159 : f32 to vector<8x128xf32>
    %161 = arith.mulf %87, %160 : vector<8x128xf32>
    %162 = arith.addf %158, %161 : vector<8x128xf32>
    %c43 = arith.constant 43 : index
    %163 = memref.load %arg1[%c43] : memref<51xf32, #tpu.memory_space<smem>>
    %164 = vector.broadcast %163 : f32 to vector<8x128xf32>
    %165 = arith.addf %162, %164 : vector<8x128xf32>
    %cst_18 = arith.constant 0.000000e+00 : f32
    %166 = vector.broadcast %cst_18 : f32 to vector<8x128xf32>
    %167 = arith.maximumf %165, %166 : vector<8x128xf32>
    %c36 = arith.constant 36 : index
    %168 = memref.load %arg1[%c36] : memref<51xf32, #tpu.memory_space<smem>>
    %169 = vector.broadcast %168 : f32 to vector<8x128xf32>
    %170 = arith.mulf %27, %169 : vector<8x128xf32>
    %c37 = arith.constant 37 : index
    %171 = memref.load %arg1[%c37] : memref<51xf32, #tpu.memory_space<smem>>
    %172 = vector.broadcast %171 : f32 to vector<8x128xf32>
    %173 = arith.mulf %47, %172 : vector<8x128xf32>
    %174 = arith.addf %170, %173 : vector<8x128xf32>
    %c38 = arith.constant 38 : index
    %175 = memref.load %arg1[%c38] : memref<51xf32, #tpu.memory_space<smem>>
    %176 = vector.broadcast %175 : f32 to vector<8x128xf32>
    %177 = arith.mulf %67, %176 : vector<8x128xf32>
    %178 = arith.addf %174, %177 : vector<8x128xf32>
    %c39 = arith.constant 39 : index
    %179 = memref.load %arg1[%c39] : memref<51xf32, #tpu.memory_space<smem>>
    %180 = vector.broadcast %179 : f32 to vector<8x128xf32>
    %181 = arith.mulf %87, %180 : vector<8x128xf32>
    %182 = arith.addf %178, %181 : vector<8x128xf32>
    %c44 = arith.constant 44 : index
    %183 = memref.load %arg1[%c44] : memref<51xf32, #tpu.memory_space<smem>>
    %184 = vector.broadcast %183 : f32 to vector<8x128xf32>
    %185 = arith.addf %182, %184 : vector<8x128xf32>
    %cst_19 = arith.constant 0.000000e+00 : f32
    %186 = vector.broadcast %cst_19 : f32 to vector<8x128xf32>
    %187 = arith.maximumf %185, %186 : vector<8x128xf32>
    %c45 = arith.constant 45 : index
    %188 = memref.load %arg1[%c45] : memref<51xf32, #tpu.memory_space<smem>>
    %189 = vector.broadcast %188 : f32 to vector<8x128xf32>
    %190 = arith.mulf %107, %189 : vector<8x128xf32>
    %c46 = arith.constant 46 : index
    %191 = memref.load %arg1[%c46] : memref<51xf32, #tpu.memory_space<smem>>
    %192 = vector.broadcast %191 : f32 to vector<8x128xf32>
    %193 = arith.mulf %127, %192 : vector<8x128xf32>
    %194 = arith.addf %190, %193 : vector<8x128xf32>
    %c47 = arith.constant 47 : index
    %195 = memref.load %arg1[%c47] : memref<51xf32, #tpu.memory_space<smem>>
    %196 = vector.broadcast %195 : f32 to vector<8x128xf32>
    %197 = arith.mulf %147, %196 : vector<8x128xf32>
    %198 = arith.addf %194, %197 : vector<8x128xf32>
    %c48 = arith.constant 48 : index
    %199 = memref.load %arg1[%c48] : memref<51xf32, #tpu.memory_space<smem>>
    %200 = vector.broadcast %199 : f32 to vector<8x128xf32>
    %201 = arith.mulf %167, %200 : vector<8x128xf32>
    %202 = arith.addf %198, %201 : vector<8x128xf32>
    %c49 = arith.constant 49 : index
    %203 = memref.load %arg1[%c49] : memref<51xf32, #tpu.memory_space<smem>>
    %204 = vector.broadcast %203 : f32 to vector<8x128xf32>
    %205 = arith.mulf %187, %204 : vector<8x128xf32>
    %206 = arith.addf %202, %205 : vector<8x128xf32>
    %c50 = arith.constant 50 : index
    %207 = memref.load %arg1[%c50] : memref<51xf32, #tpu.memory_space<smem>>
    %208 = vector.broadcast %207 : f32 to vector<8x128xf32>
    %209 = arith.addf %206, %208 : vector<8x128xf32>
    %c0_20 = arith.constant 0 : index
    %c0_21 = arith.constant 0 : index
    %c0_22 = arith.constant 0 : index
    %210 = vector.load %arg3[%c0_20, %c0_21, %c0_22] : memref<1x8x128xf32, #tpu.memory_space<vmem>>, vector<1x8x128xf32>
    %211 = vector.shape_cast %210 : vector<1x8x128xf32> to vector<8x128xf32>
    %212 = vector.shape_cast %209 : vector<8x128xf32> to vector<1x8x128xf32>
    tpu.vector_store %arg3[%c0_20, %c0_21, %c0_22], %212 {strides = array<i32>} : memref<1x8x128xf32, #tpu.memory_space<vmem>>, vector<1x8x128xf32>,
    return
  }
  func.func @transform_0(%arg0: i32) -> i32 {
    %c0_i32 = arith.constant 0 : i32
    %c0_i32_0 = arith.constant 0 : i32
    return %c0_i32 : i32
  }
  func.func @transform_1(%arg0: i32) -> (i32, i32, i32) {
    %c0_i32 = arith.constant 0 : i32
    %c0_i32_0 = arith.constant 0 : i32
    %c0_i32_1 = arith.constant 0 : i32
    return %c0_i32, %arg0, %c0_i32_0 : i32, i32, i32
  }
  func.func @transform_2(%arg0: i32) -> (i32, i32, i32) {
    %c0_i32 = arith.constant 0 : i32
    %c0_i32_0 = arith.constant 0 : i32
    %c0_i32_1 = arith.constant 0 : i32
    return %c0_i32, %arg0, %c0_i32_0 : i32, i32, i32
  }
}

</mosaic_0001>

<bundles_post_ra>
// kernel: value_net_forward.1
= control target key start
LH: loop header
LB: loop body
LE: loop exit
PB: predicated region body
PF: predicated region fallthrough
CT: control target
= control target key end

     0   :  { %7 = vsyncpa [#allocation3], 0  ;;  %s499_s0 = inlined_call_operand.vmem [shape: f32[51], index: 0, kind: input, shape index: {}]   ;;  %s500_s1 = inlined_call_operand.vmem [shape: f32[4,8,128], index: 1, kind: input, shape index: {}]   ;;  %s501_s2 = inlined_call_operand.vmem [shape: f32[1,8,128], index: 2, kind: output, shape index: {}]  }
   0x1   :  { %s14_s11 = sshll.u32 %s499_s0, 4  ;;  %s15_s11 = int_to_ptr.vmem [resolvable:$true] %s14_s11 }
   0x2   :  { %s284_s12 = scalar_lea.vmem %s15_s11, 16  ;;  %p289_p1 = scmp.lt.s32.totalorder %s15_s11, %s15_s11 }
   0x3   :  { %p285_p0 = scmp.ne.s32.totalorder %s15_s11, %s284_s12  ;;  %p290_p2 = scmp.lt.s32.totalorder %s284_s12, %s284_s12 }
   0x5   :  { %p291_p3 = por %p290_p2, %p289_p1 }
   0x7   :  { %p292_p4 = pnand %p291_p3, %p285_p0 }
   0x9   :  { %295 = shalt.err (!%p292_p4)
}
   0xa   :  { %s298_s13 = smov [#allocation2]  }
   0xb   :  { %17 = dma.vmem_to_smem %s15_s11, 16, %s298_s13, [#allocation3]  }
   0xc   :  { %296 = dma.done.wait [#allocation3], 16  }
   0xd   :  { %297 = vsyncadd [#allocation3], 4294967280 }
   0xe   :  { %23 = sfence }
   0xf   :  { %s31_s14 = sld [smem:[#allocation2]]  ;;  %s233_s15 = sld [smem:[#allocation2 + $0x1]]  ;;  %v322_v0 = vld [vmem:[%s500_s1] sm:$0xff]  ;;  %v331_v1 = vld [vmem:[%s500_s1 + $0x8] sm:$0xff]  ;;  %v336_v2 = vld [vmem:[%s500_s1 + $0x10] sm:$0xff] }
  0x10   :  { %s234_s16 = sld [smem:[#allocation2 + $0x2]]  ;;  %s235_s17 = sld [smem:[#allocation2 + $0x3]]  ;;  %v345_v3 = vld [vmem:[%s500_s1 + $0x18] sm:$0xff] }
  0x11   :  { %s317_s18 = sld [smem:[#allocation2 + $0x10]]  ;;  %s237_s0 = sld [smem:[#allocation2 + $0x4]] }
  0x12   :  { %s238_s19 = sld [smem:[#allocation2 + $0x5]]  ;;  %s324_s22 = sld [smem:[#allocation2 + $0x6]] }
  0x13   :  { %s326_s23 = sld [smem:[#allocation2 + $0x7]]  ;;  %s338_s28 = sld [smem:[#allocation2 + $0x11]] }
  0x14   :  { %s340_s29 = sld [smem:[#allocation2 + $0x8]]  ;;  %s347_s4 = sld [smem:[#allocation2 + $0x9]] }
  0x15   :  { %v32_v4 = vstv %s31_s14  ;;  %s349_s5 = sld [smem:[#allocation2 + $0xa]]  ;;  %v35_v6 = vstv %s233_s15  ;;  %s352_s6 = sld [smem:[#allocation2 + $0xb]] }
  0x16   :  { %v33_v5 = vmul.f32 %v32_v4, %v322_v0  ;;  %v39_v7 = vstv %s234_s16  ;;  %s354_s7 = sld [smem:[#allocation2 + $0x12]]  ;;  %v36_v8 = vmul.f32 %v331_v1, %v35_v6  ;;  %v43_v10 = vstv %s235_s17  ;;  %s358_s1 = sld [smem:[#allocation2 + $0xc]] }
  0x17   :  { %v40_v9 = vmul.f32 %v336_v2, %v39_v7  ;;  %s360_s8 = sld [smem:[#allocation2 + $0xd]]  ;;  %v44_v11 = vmul.f32 %v345_v3, %v43_v10  ;;  %v47_v12 = vstv %s317_s18  ;;  %v51_v13 = vstv %s237_s0  ;;  %s364_s9 = sld [smem:[#allocation2 + $0xe]] }
  0x18   :  { %v54_v14 = vstv %s238_s19  ;;  %s366_s10 = sld [smem:[#allocation2 + $0xf]]  ;;  %v37_v15 = vadd.f32 %v36_v8, %v33_v5  ;;  %v52_v16 = vmul.f32 %v51_v13, %v322_v0  ;;  %v58_v18 = vstv %s324_s22  ;;  %s371_s11 = sld [smem:[#allocation2 + $0x13]] }
  0x19   :  { %v55_v17 = vmul.f32 %v331_v1, %v54_v14  ;;  %s373_s12 = sld [smem:[#allocation2 + $0x14]]  ;;  %v59_v19 = vmul.f32 %v336_v2, %v58_v18  ;;  %v62_v20 = vstv %s326_s23  ;;  %v66_v21 = vstv %s338_s28  ;;  %s379_s13 = sld [smem:[#allocation2 + $0x15]] }
  0x1a   :  { %v70_v22 = vstv %s340_s29  ;;  %s381_s14 = sld [smem:[#allocation2 + $0x16]]  ;;  %v41_v23 = vadd.f32 %v40_v9, %v37_v15  ;;  %v63_v25 = vmul.f32 %v345_v3, %v62_v20  ;;  %s385_s15 = sld [smem:[#allocation2 + $0x17]]  ;;  %v73_v27 = vstv %s347_s4 }
  0x1b   :  { %v56_v24 = vadd.f32 %v55_v17, %v52_v16  ;;  %v71_v26 = vmul.f32 %v70_v22, %v322_v0  ;;  %s387_s16 = sld [smem:[#allocation2 + $0x28]]  ;;  %v77_v28 = vstv %s349_s5  ;;  %v81_v29 = vstv %s352_s6  ;;  %s395_s18 = sld [smem:[#allocation2 + $0x19]] }
  0x1c   :  { %v85_v30 = vstv %s354_s7  ;;  %s393_s17 = sld [smem:[#allocation2 + $0x18]]  ;;  %v45_v31 = vadd.f32 %v44_v11, %v41_v23  ;;  %v74_v33 = vmul.f32 %v331_v1, %v73_v27  ;;  %v78_v34 = vmul.f32 %v336_v2, %v77_v28  ;;  %s399_s0 = sld [smem:[#allocation2 + $0x1a]] }
  0x1d   :  { %v60_v32 = vadd.f32 %v59_v19, %v56_v24  ;;  %v82_v35 = vmul.f32 %v345_v3, %v81_v29  ;;  %v89_v36 = vstv %s358_s1  ;;  %v92_v37 = vstv %s360_s8  ;;  %s405_s19 = sld [smem:[#allocation2 + $0x1b]]  ;;  %s407_s20 = sld [smem:[#allocation2 + $0x29]] }
  0x1e   :  { %v96_v38 = vstv %s364_s9  ;;  %v48_v39 = vadd.f32 %v47_v12, %v45_v31  ;;  %v75_v41 = vadd.f32 %v74_v33, %v71_v26  ;;  %v90_v42 = vmul.f32 %v89_v36, %v322_v0  ;;  %s410_s21 = sld [smem:[#allocation2 + $0x1c]]  ;;  %s416_s22 = sld [smem:[#allocation2 + $0x1d]] }
  0x1f   :  { %v64_v40 = vadd.f32 %v63_v25, %v60_v32  ;;  %v93_v43 = vmul.f32 %v331_v1, %v92_v37  ;;  %v97_v44 = vmul.f32 %v336_v2, %v96_v38  ;;  %v100_v45 = vstv %s366_s10  ;;  %s418_s23 = sld [smem:[#allocation2 + $0x1e]]  ;;  %s423_s24 = sld [smem:[#allocation2 + $0x1f]] }
  0x20   :  { %v104_v46 = vstv %s371_s11  ;;  %v420_v47 = vmax.f32 %v48_v39, 0.0  ;;  %v79_v49 = vadd.f32 %v78_v34, %v75_v41  ;;  %v101_v50 = vmul.f32 %v345_v3, %v100_v45  ;;  %s428_s25 = sld [smem:[#allocation2 + $0x2a]]  ;;  %s430_s26 = sld [smem:[#allocation2 + $0x20]] }
  0x21   :  { %v67_v48 = vadd.f32 %v66_v21, %v64_v40  ;;  %v94_v51 = vadd.f32 %v93_v43, %v90_v42  ;;  %v108_v52 = vstv %s373_s12  ;;  %v111_v53 = vstv %s379_s13  ;;  %s439_s27 = sld [smem:[#allocation2 + $0x21]]  ;;  %s444_s28 = sld [smem:[#allocation2 + $0x22]] }
  0x22   :  { %v115_v54 = vstv %s381_s14  ;;  %v83_v56 = vadd.f32 %v82_v35, %v79_v49  ;;  %v109_v57 = vmul.f32 %v108_v52, %v420_v47  ;;  %v119_v58 = vstv %s385_s15  ;;  %s446_s29 = sld [smem:[#allocation2 + $0x23]]  ;;  %s454_s3 = sld [smem:[#allocation2 + $0x24]] }
  0x23   :  { %v432_v55 = vmax.f32 %v67_v48, 0.0  ;;  %v98_v59 = vadd.f32 %v97_v44, %v94_v51  ;;  %v123_v60 = vstv %s387_s16  ;;  %v127_v61 = vstv %s393_s17  ;;  %s452_s30 = sld [smem:[#allocation2 + $0x2b]]  ;;  %s459_s4 = sld [smem:[#allocation2 + $0x25]] }
  0x24   :  { %v130_v62 = vstv %s395_s18  ;;  %v86_v63 = vadd.f32 %v85_v30, %v83_v56  ;;  %v128_v1 = vmul.f32 %v127_v61, %v420_v47  ;;  %v134_v4 = vstv %s399_s0  ;;  %s462_s5 = sld [smem:[#allocation2 + $0x26]]  ;;  %s467_s6 = sld [smem:[#allocation2 + $0x27]] }
  0x25   :  { %v112_v0 = vmul.f32 %v111_v53, %v432_v55  ;;  %v131_v2 = vmul.f32 %v130_v62, %v432_v55  ;;  %v102_v3 = vadd.f32 %v101_v50, %v98_v59  ;;  %v138_v5 = vstv %s405_s19  ;;  %s470_s7 = sld [smem:[#allocation2 + $0x2d]]  ;;  %s473_s1 = sld [smem:[#allocation2 + $0x2e]] }
  0x26   :  { %v142_v6 = vstv %s407_s20  ;;  %v87_v7 = vmax.f32 %v86_v63, 0.0  ;;  %v146_v10 = vstv %s410_s21  ;;  %v149_v13 = vstv %s416_s22  ;;  %s475_s8 = sld [smem:[#allocation2 + $0x2f]]  ;;  %s480_s9 = sld [smem:[#allocation2 + $0x2c]] }
  0x27   :  { %v113_v8 = vadd.f32 %v112_v0, %v109_v57  ;;  %v132_v9 = vadd.f32 %v131_v2, %v128_v1  ;;  %v105_v11 = vadd.f32 %v104_v46, %v102_v3  ;;  %v147_v12 = vmul.f32 %v146_v10, %v420_v47  ;;  %s482_s10 = sld [smem:[#allocation2 + $0x30]]  ;;  %s281_s11 = sld [smem:[#allocation2 + $0x31]] }
  0x28   :  { %v153_v14 = vstv %s418_s23  ;;  %v116_v15 = vmul.f32 %v115_v54, %v87_v7  ;;  %v135_v16 = vmul.f32 %v134_v4, %v87_v7  ;;  %v150_v17 = vmul.f32 %v149_v13, %v432_v55  ;;  %s282_s12 = sld [smem:[#allocation2 + $0x32]] }
  0x29   :  { %v154_v18 = vmul.f32 %v153_v14, %v87_v7  ;;  %v106_v19 = vmax.f32 %v105_v11, 0.0  ;;  %v157_v20 = vstv %s423_s24  ;;  %v161_v21 = vstv %s428_s25 }
  0x2a   :  { %v165_v22 = vstv %s430_s26  ;;  %v117_v23 = vadd.f32 %v116_v15, %v113_v8  ;;  %v136_v24 = vadd.f32 %v135_v16, %v132_v9  ;;  %v151_v25 = vadd.f32 %v150_v17, %v147_v12 }
  0x2b   :  { %v166_v26 = vmul.f32 %v165_v22, %v420_v47  ;;  %v120_v27 = vmul.f32 %v119_v58, %v106_v19  ;;  %v139_v28 = vmul.f32 %v138_v5, %v106_v19  ;;  %v158_v29 = vmul.f32 %v157_v20, %v106_v19 }
  0x2c   :  { %v168_v30 = vstv %s439_s27  ;;  %v155_v31 = vadd.f32 %v154_v18, %v151_v25  ;;  %v172_v33 = vstv %s444_s28  ;;  %v176_v34 = vstv %s446_s29 }
  0x2d   :  { %v169_v32 = vmul.f32 %v168_v30, %v432_v55  ;;  %v121_v35 = vadd.f32 %v120_v27, %v117_v23  ;;  %v140_v36 = vadd.f32 %v139_v28, %v136_v24  ;;  %v173_v37 = vmul.f32 %v172_v33, %v87_v7 }
  0x2e   :  { %v177_v38 = vmul.f32 %v176_v34, %v106_v19  ;;  %v159_v39 = vadd.f32 %v158_v29, %v155_v31  ;;  %v180_v41 = vstv %s452_s30  ;;  %v184_v42 = vstv %s454_s3 }
  0x2f   :  { %v170_v40 = vadd.f32 %v169_v32, %v166_v26  ;;  %v124_v43 = vadd.f32 %v123_v60, %v121_v35  ;;  %v143_v44 = vadd.f32 %v142_v6, %v140_v36  ;;  %v185_v45 = vmul.f32 %v184_v42, %v420_v47 }
  0x30   :  { %v187_v46 = vstv %s459_s4  ;;  %v162_v48 = vadd.f32 %v161_v21, %v159_v39  ;;  %v191_v51 = vstv %s462_s5  ;;  %v195_v56 = vstv %s467_s6 }
  0x31   :  { %v174_v49 = vadd.f32 %v173_v37, %v170_v40  ;;  %v188_v50 = vmul.f32 %v187_v46, %v432_v55  ;;  %v125_v52 = vmax.f32 %v124_v43, 0.0  ;;  %v144_v53 = vmax.f32 %v143_v44, 0.0 }
  0x32   :  { %v192_v54 = vmul.f32 %v191_v51, %v87_v7  ;;  %v163_v57 = vmax.f32 %v162_v48, 0.0  ;;  %v196_v60 = vmul.f32 %v195_v56, %v106_v19  ;;  %v203_v47 = vstv %s470_s7 }
  0x33   :  { %v178_v58 = vadd.f32 %v177_v38, %v174_v49  ;;  %v189_v59 = vadd.f32 %v188_v50, %v185_v45  ;;  %v206_v61 = vstv %s473_s1  ;;  %v210_v62 = vstv %s475_s8 }
  0x34   :  { %v204_v1 = vmul.f32 %v203_v47, %v125_v52  ;;  %v207_v2 = vmul.f32 %v206_v61, %v144_v53  ;;  %v199_v55 = vstv %s480_s9  ;;  %v211_v3 = vmul.f32 %v210_v62, %v163_v57 }
  0x35   :  { %v181_v63 = vadd.f32 %v180_v41, %v178_v58  ;;  %v193_v0 = vadd.f32 %v192_v54, %v189_v59  ;;  %v214_v4 = vstv %s482_s10  ;;  %v218_v11 = vstv %s281_s11 }
  0x36   :  { %v208_v7 = vadd.f32 %v207_v2, %v204_v1  ;;  %v222_v15 = vstv %s282_s12 }
  0x37   :  { %v182_v5 = vmax.f32 %v181_v63, 0.0  ;;  %v197_v6 = vadd.f32 %v196_v60, %v193_v0 }
  0x38   :  { %v212_v9 = vadd.f32 %v211_v3, %v208_v7 }
  0x39   :  { %v200_v8 = vadd.f32 %v199_v55, %v197_v6  ;;  %v215_v10 = vmul.f32 %v214_v4, %v182_v5 }
  0x3b   :  { %v201_v12 = vmax.f32 %v200_v8, 0.0  ;;  %v216_v13 = vadd.f32 %v215_v10, %v212_v9 }
  0x3d   :  { %v219_v14 = vmul.f32 %v218_v11, %v201_v12 }
  0x3f   :  { %v220_v16 = vadd.f32 %v219_v14, %v216_v13 }
  0x41   :  { %v223_v17 = vadd.f32 %v222_v15, %v220_v16 }
  0x43   :  { %224 = vst [vmem:[%s501_s2] sm:$0xff] %v223_v17 }
  0x44   :  { %229 = vsyncpa [#allocation3], 1 }

</bundles_post_ra>
